<compile_context>
chip_gen: v6e
topology: v6e:2x2x1
jax: 0.10.0
libtpu: 0.0.40
codegen_flags: <defaults>
</compile_context>

<pallas_src>
import functools

import jax
import jax.numpy as jnp
from jax.experimental import pallas as pl
from jax.experimental.pallas import tpu as pltpu

LANE = 128     # lane width (last-dim granularity)
SUBLANE = 8    # sublane granularity (second-to-last dim, f32)


def _round_up(x, m):
    return ((x + m - 1) // m) * m


# --------------------------------------------------------------------------
# Kernel: fused chain of Linear(+bias)+ReLU layers on one batch tile.
# --------------------------------------------------------------------------
def _mlp_kernel(x_ref, *refs):
    """refs = (w0, b0, w1, b1, ..., out). Activations never leave VMEM/vregs."""
    *wb_refs, o_ref = refs
    n_layers = len(wb_refs) // 2

    h = x_ref[...]                                  # native (bf16 or f32) read
    for li in range(n_layers):                      # static unroll over layers
        w = wb_refs[2 * li][...]
        b = wb_refs[2 * li + 1][...]                # (1, D_out) f32
        # MXU matmul in the weights' dtype with f32 accumulation; bias + ReLU
        # epilogue on the VPU in f32 (correct on v5e which has no bf16 VPU).
        h = jnp.dot(h.astype(w.dtype), w, preferred_element_type=jnp.float32)
        h = jnp.maximum(h + b, 0.0)
    o_ref[...] = h.astype(o_ref.dtype)              # single lane-dense store


# --------------------------------------------------------------------------
# Parameter init (mirrors nn.Linear kaiming-normal weights + uniform bias),
# pre-transposed to (in, out) and zero-padded to multiples of 128.
# --------------------------------------------------------------------------
def init_dnn_params(key, inputs_dim, hidden_units, weight_dtype=jnp.bfloat16):
    dims = [inputs_dim] + list(hidden_units)
    params = []
    for i in range(len(dims) - 1):
        fan_in, fan_out = dims[i], dims[i + 1]
        key, kw, kb = jax.random.split(key, 3)
        std = (2.0 / fan_in) ** 0.5                       # kaiming_normal_
        w = jax.random.normal(kw, (fan_out, fan_in), jnp.float32) * std
        bound = 1.0 / (fan_in ** 0.5)
        b = jax.random.uniform(kb, (fan_out,), jnp.float32, -bound, bound)

        in_pad = _round_up(fan_in, LANE)
        out_pad = _round_up(fan_out, LANE)
        w_t = jnp.zeros((in_pad, out_pad), jnp.float32).at[:fan_in, :fan_out].set(w.T)
        b_p = jnp.zeros((1, out_pad), jnp.float32).at[0, :fan_out].set(b)
        params.append((w_t.astype(weight_dtype), b_p))    # bias stays f32
    return params


# --------------------------------------------------------------------------
# Wrapper helpers
# --------------------------------------------------------------------------
def _vmem_limit_bytes():
    """Per-generation VMEM limit with headroom (~3/4 of physical per TC)."""
    try:
        cap = getattr(pltpu.get_tpu_info(), "vmem_capacity_bytes", None)
        if cap:
            return int(cap * 3 // 4)       # ~48 MiB on v7x, ~96 MiB on v5e/v6e
    except Exception:
        pass
    return 64 * 1024 * 1024                # conservative fallback


def _resident_spec(shape):
    """Grid-invariant block (weights / bias): same block every grid step,
    single-buffered so it is not pointlessly double-buffered in VMEM."""
    idx_map = lambda i: (0,) * len(shape)
    try:
        return pl.BlockSpec(shape, idx_map, pipeline_mode=pl.Buffered(1))
    except (TypeError, AttributeError):    # older API without pipeline_mode
        return pl.BlockSpec(shape, idx_map)


def _choose_tm(B, tm_max):
    """Batch-tile size: MXU-aligned, waste-aware, >=2 steps when free."""
    if B < 256:
        return _round_up(B, SUBLANE)               # tiny batch: one small tile
    n_tiles = pl.cdiv(B, tm_max)
    tm = pl.cdiv(B, n_tiles * 256) * 256           # 256-aligned M (full MXU)
    if n_tiles == 1 and tm >= 512:                 # single step idles one v7x TC
        tm = _round_up(tm // 2, 128)
    return tm


def _chunk_layers(params, tm, budget):
    """Greedily group consecutive layers so each fused pallas_call's weights,
    biases and (double-buffered) activation tiles fit the VMEM budget."""
    chunks, cur, cur_bytes = [], [], 0
    for (w, b) in params:
        din, dout = w.shape
        wb = din * dout * w.dtype.itemsize + b.size * b.dtype.itemsize
        act = 2 * tm * (din + dout) * 4            # conservative f32 i/o tiles
        if cur and cur_bytes + wb + act > budget:
            chunks.append(cur)
            cur, cur_bytes = [], 0
        cur.append((w, b))
        cur_bytes += wb
    if cur:
        chunks.append(cur)
    return chunks


# --------------------------------------------------------------------------
# Fused DNN forward
# --------------------------------------------------------------------------
@functools.partial(jax.jit, static_argnames=("out_dim", "tm_max", "out_dtype"))
def dnn_forward(x, params, *, out_dim, tm_max=1024, out_dtype=None):
    """x: (B, inputs_dim); params: padded (w_t, b) list from init_dnn_params.

    Compute dtype follows the weight dtype (bf16 default, f32 for exact path).
    out_dtype=None keeps x.dtype; pass jnp.bfloat16 to halve output writeback.
    """
    B, D_in = x.shape
    D_in_pad = params[0][0].shape[0]
    compute_dtype = params[0][0].dtype
    out_dtype = x.dtype if out_dtype is None else out_dtype

    vmem_limit = _vmem_limit_bytes()
    budget = int(vmem_limit * 0.8)

    tm = _choose_tm(B, tm_max)
    B_pad = _round_up(B, tm)
    grid = (B_pad // tm,)

    # Wrapper-side pad only when actually needed (avoids an extra HBM copy).
    h = x.astype(compute_dtype)
    if B_pad != B or D_in_pad != D_in:
        h = jnp.zeros((B_pad, D_in_pad), compute_dtype).at[:B, :D_in].set(h)

    chunks = _chunk_layers(params, tm, budget)
    for ci, chunk in enumerate(chunks):
        last = ci == len(chunks) - 1
        d_out_chunk = chunk[-1][0].shape[1]
        chunk_out_dtype = out_dtype if last else compute_dtype

        in_specs = [pl.BlockSpec((tm, h.shape[1]), lambda i: (i, 0))]
        flat_args = [h]
        flops = 0
        bytes_accessed = h.size * h.dtype.itemsize
        for (w, b) in chunk:
            din, dout = w.shape
            in_specs.append(_resident_spec((din, dout)))   # VMEM-resident weight
            in_specs.append(_resident_spec((1, dout)))     # VMEM-resident bias
            flat_args += [w, b]
            flops += 2 * B_pad * din * dout
            bytes_accessed += w.size * w.dtype.itemsize + b.size * b.dtype.itemsize
        bytes_accessed += B_pad * d_out_chunk * jnp.dtype(chunk_out_dtype).itemsize

        h = pl.pallas_call(
            _mlp_kernel,
            out_shape=jax.ShapeDtypeStruct((B_pad, d_out_chunk), chunk_out_dtype),
            grid=grid,
            in_specs=in_specs,
            out_specs=pl.BlockSpec((tm, d_out_chunk), lambda i: (i, 0)),
            compiler_params=pltpu.CompilerParams(
                dimension_semantics=("parallel",),   # shard batch tiles over TCs
                vmem_limit_bytes=vmem_limit,
            ),
            cost_estimate=pl.CostEstimate(
                flops=flops, transcendentals=0, bytes_accessed=bytes_accessed),
        )(*flat_args)

    # Strip batch / feature padding only if present (padded lanes are zero).
    if B_pad != B or h.shape[1] != out_dim:
        h = h[:B, :out_dim]
    return h


# --------------------------------------------------------------------------
# Self-test
# --------------------------------------------------------------------------
if __name__ == "__main__":
    key = jax.random.PRNGKey(0)
    k_x, k_p = jax.random.split(key)

    batch = 8
    inputs_dim = 32
    hidden_units = (64, 32)

    x = jax.random.normal(k_x, (batch, inputs_dim), jnp.float32)

    params_f32 = init_dnn_params(k_p, inputs_dim, hidden_units,
                                 weight_dtype=jnp.float32)
    params_bf16 = [(w.astype(jnp.bfloat16), b) for (w, b) in params_f32]

    # pure-JAX f32 reference on the unpadded sub-blocks of the padded params
    dims = [inputs_dim] + list(hidden_units)
    ref = x
    for (w_t, b), din, dout in zip(params_f32, dims[:-1], dims[1:]):
        ref = jnp.maximum(ref @ w_t[:din, :dout] + b[:, :dout], 0.0)

    # exact f32 path
    out_f32 = dnn_forward(x, params_f32, out_dim=hidden_units[-1])
    jax.block_until_ready(out_f32)
    assert out_f32.shape == (batch, hidden_units[-1])
    assert jnp.allclose(out_f32, ref, atol=1e-5, rtol=1e-5)

    # default bf16 compute path (f32 accumulation) -> looser tolerance
    out_bf16 = dnn_forward(x, params_bf16, out_dim=hidden_units[-1])
    jax.block_until_ready(out_bf16)
    assert out_bf16.shape == (batch, hidden_units[-1])
    assert jnp.allclose(out_bf16, ref, atol=5e-2, rtol=5e-2)

    print("KERNEL_OK")
</pallas_src>

<mosaic_0001>
module attributes {stable_mosaic.version = 11 : i64} {
  func.func @_mlp_kernel(%arg0: i32, %arg1: memref<8x128xf32, #tpu.memory_space<vmem>>, %arg2: memref<128x128xf32, #tpu.memory_space<vmem>>, %arg3: memref<1x128xf32, #tpu.memory_space<vmem>>, %arg4: memref<128x128xf32, #tpu.memory_space<vmem>>, %arg5: memref<1x128xf32, #tpu.memory_space<vmem>>, %arg6: memref<8x128xf32, #tpu.memory_space<vmem>>) attributes {dimension_semantics = [#tpu.dimension_semantics<parallel>], iteration_bounds = array<i64: 1>, scalar_prefetch = 0 : i64, scratch_operands = 0 : i64, tpu.core_type = #tpu.core_type<tc>, window_params = [{transform_indices = @transform_0, window_bounds = array<i64: 8, 128>}, {pipeline_mode = #tpu.pipeline_mode<synchronous>, transform_indices = @transform_1, window_bounds = array<i64: 128, 128>}, {pipeline_mode = #tpu.pipeline_mode<synchronous>, transform_indices = @transform_2, window_bounds = array<i64: 1, 128>}, {pipeline_mode = #tpu.pipeline_mode<synchronous>, transform_indices = @transform_3, window_bounds = array<i64: 128, 128>}, {pipeline_mode = #tpu.pipeline_mode<synchronous>, transform_indices = @transform_4, window_bounds = array<i64: 1, 128>}, {transform_indices = @transform_5, window_bounds = array<i64: 8, 128>}]} {
    %c0 = arith.constant 0 : index
    %c0_0 = arith.constant 0 : index
    %0 = vector.load %arg1[%c0, %c0_0] : memref<8x128xf32, #tpu.memory_space<vmem>>, vector<8x128xf32>
    %c0_1 = arith.constant 0 : index
    %c0_2 = arith.constant 0 : index
    %1 = vector.load %arg2[%c0_1, %c0_2] : memref<128x128xf32, #tpu.memory_space<vmem>>, vector<128x128xf32>
    %c0_3 = arith.constant 0 : index
    %c0_4 = arith.constant 0 : index
    %2 = vector.load %arg3[%c0_3, %c0_4] : memref<1x128xf32, #tpu.memory_space<vmem>>, vector<1x128xf32>
    %cst = arith.constant dense<0.000000e+00> : vector<8x128xf32>
    %3 = tpu.matmul %0, %1, %cst {dimension_numbers = #tpu.dot_dimension_numbers<[1], [0], [0], [1], [0, 0, 1, 1], [], []>} : vector<8x128xf32>, vector<128x128xf32>, vector<8x128xf32> -> vector<8x128xf32>
    %4 = vector.broadcast %2 : vector<1x128xf32> to vector<8x128xf32>
    %5 = arith.addf %3, %4 : vector<8x128xf32>
    %cst_5 = arith.constant 0.000000e+00 : f32
    %6 = vector.broadcast %cst_5 : f32 to vector<8x128xf32>
    %7 = arith.maximumf %5, %6 : vector<8x128xf32>
    %c0_6 = arith.constant 0 : index
    %c0_7 = arith.constant 0 : index
    %8 = vector.load %arg4[%c0_6, %c0_7] : memref<128x128xf32, #tpu.memory_space<vmem>>, vector<128x128xf32>
    %c0_8 = arith.constant 0 : index
    %c0_9 = arith.constant 0 : index
    %9 = vector.load %arg5[%c0_8, %c0_9] : memref<1x128xf32, #tpu.memory_space<vmem>>, vector<1x128xf32>
    %cst_10 = arith.constant dense<0.000000e+00> : vector<8x128xf32>
    %10 = tpu.matmul %7, %8, %cst_10 {dimension_numbers = #tpu.dot_dimension_numbers<[1], [0], [0], [1], [0, 0, 1, 1], [], []>} : vector<8x128xf32>, vector<128x128xf32>, vector<8x128xf32> -> vector<8x128xf32>
    %11 = vector.broadcast %9 : vector<1x128xf32> to vector<8x128xf32>
    %12 = arith.addf %10, %11 : vector<8x128xf32>
    %cst_11 = arith.constant 0.000000e+00 : f32
    %13 = vector.broadcast %cst_11 : f32 to vector<8x128xf32>
    %14 = arith.maximumf %12, %13 : vector<8x128xf32>
    %c0_12 = arith.constant 0 : index
    %c0_13 = arith.constant 0 : index
    %15 = vector.load %arg6[%c0_12, %c0_13] : memref<8x128xf32, #tpu.memory_space<vmem>>, vector<8x128xf32>
    tpu.vector_store %arg6[%c0_12, %c0_13], %14 {strides = array<i32>} : memref<8x128xf32, #tpu.memory_space<vmem>>, vector<8x128xf32>,
    return
  }
  func.func @transform_0(%arg0: i32) -> (i32, i32) {
    %c0_i32 = arith.constant 0 : i32
    %c0_i32_0 = arith.constant 0 : i32
    return %arg0, %c0_i32 : i32, i32
  }
  func.func @transform_1(%arg0: i32) -> (i32, i32) {
    %c0_i32 = arith.constant 0 : i32
    %c0_i32_0 = arith.constant 0 : i32
    %c0_i32_1 = arith.constant 0 : i32
    return %c0_i32, %c0_i32_0 : i32, i32
  }
  func.func @transform_2(%arg0: i32) -> (i32, i32) {
    %c0_i32 = arith.constant 0 : i32
    %c0_i32_0 = arith.constant 0 : i32
    %c0_i32_1 = arith.constant 0 : i32
    return %c0_i32, %c0_i32_0 : i32, i32
  }
  func.func @transform_3(%arg0: i32) -> (i32, i32) {
    %c0_i32 = arith.constant 0 : i32
    %c0_i32_0 = arith.constant 0 : i32
    %c0_i32_1 = arith.constant 0 : i32
    return %c0_i32, %c0_i32_0 : i32, i32
  }
  func.func @transform_4(%arg0: i32) -> (i32, i32) {
    %c0_i32 = arith.constant 0 : i32
    %c0_i32_0 = arith.constant 0 : i32
    %c0_i32_1 = arith.constant 0 : i32
    return %c0_i32, %c0_i32_0 : i32, i32
  }
  func.func @transform_5(%arg0: i32) -> (i32, i32) {
    %c0_i32 = arith.constant 0 : i32
    %c0_i32_0 = arith.constant 0 : i32
    return %arg0, %c0_i32 : i32, i32
  }
}

</mosaic_0001>

<bundles_post_ra>
// kernel: dnn_forward.1
= control target key start
LH: loop header
LB: loop body
LE: loop exit
PB: predicated region body
PF: predicated region fallthrough
CT: control target
= control target key end

     0   :  { %10 = vsyncpa [#allocation3], 0  ;;  %s523_s0 = inlined_call_operand.vmem [shape: f32[8,128], index: 0, kind: input, shape index: {}]   ;;  %s524_s1 = inlined_call_operand.hbm [shape: f32[128,128], index: 1, kind: input, shape index: {}]   ;;  %s525_s2 = inlined_call_operand.vmem [shape: f32[1,128], index: 2, kind: input, shape index: {}]   ;;  %s526_s3 = inlined_call_operand.hbm [shape: f32[128,128], index: 3, kind: input, shape index: {}]   ;;  %s527_s4 = inlined_call_operand.vmem [shape: f32[1,128], index: 4, kind: input, shape index: {}]   ;;  %s528_s5 = inlined_call_operand.hbm [shape: f32[8,128], index: 5, kind: output, shape index: {}]  }
   0x1   :  { %11 = vsyncpa [#allocation6], 0 }
   0x2   :  { %12 = vsyncpa [#allocation4], 0  ;;  %s434_s18 = smov [#allocation2]  }
   0x3   :  { %s20_s19 = sshll.u32 %s434_s18, 4  ;;  %s21_s19 = int_to_ptr.vmem [resolvable:$true] %s20_s19 }
   0x4   :  { %s376_s20 = scalar_lea.vmem %s21_s19, 2048  ;;  %p381_p1 = scmp.lt.s32.totalorder %s21_s19, %s21_s19 }
   0x5   :  { %p377_p0 = scmp.ne.s32.totalorder %s21_s19, %s376_s20  ;;  %p382_p2 = scmp.lt.s32.totalorder %s376_s20, %s376_s20 }
   0x7   :  { %p383_p3 = por %p382_p2, %p381_p1 }
   0x9   :  { %p384_p4 = pnand %p383_p3, %p377_p0 }
   0xb   :  { %387 = shalt.err (!%p384_p4)
}
   0xc   :  { %s435_s21 = smov 128   ;;  %s436_s22 = smov 8  }
   0xd   :  { %26 = dma.hbm_to_vmem [thread:$0]  %s524_s1, 2048, %s21_s19, [#allocation3], %s435_s21, %s435_s21, %s436_s22  }
   0xe   :  { %s437_s25 = smov [#allocation5]  }
   0xf   :  { %s34_s26 = sshll.u32 %s437_s25, 4  ;;  %s35_s26 = int_to_ptr.vmem [resolvable:$true] %s34_s26 }
  0x10   :  { %s396_s27 = scalar_lea.vmem %s35_s26, 2048  ;;  %p401_p6 = scmp.lt.s32.totalorder %s35_s26, %s35_s26 }
  0x11   :  { %p397_p5 = scmp.ne.s32.totalorder %s35_s26, %s396_s27  ;;  %p402_p7 = scmp.lt.s32.totalorder %s396_s27, %s396_s27 }
  0x13   :  { %p403_p8 = por %p402_p7, %p401_p6 }
  0x15   :  { %p404_p9 = pnand %p403_p8, %p397_p5 }
  0x17   :  { %407 = shalt.err (!%p404_p9)
}
  0x18   :  { %40 = dma.hbm_to_vmem [thread:$0]  %s526_s3, 2048, %s35_s26, [#allocation6], %s435_s21, %s435_s21, %s436_s22  }
  0x19   :  { %428 = dma.done.wait [#allocation3], 2048  }
  0x1a   :  { %429 = vsyncadd [#allocation3], 4294965248 }
  0x1b   :  { %430 = dma.done.wait [#allocation6], 2048  }
  0x1c   :  { %431 = vsyncadd [#allocation6], 4294965248  ;;  %v438_v0 = vmov 0.0   ;;  %vm439_vm0 = vmmov 0   ;;  %v65_v1 = vld [vmem:[#allocation2 + $0x78] sm:$0xff]  ;;  %v64_v2 = vld [vmem:[#allocation2 + $0x70] sm:$0xff] }
  0x1d   :  { %291 = vmatprep.subr.mxu0 %v438_v0  ;;  %323 = vmatprep.mubr.msk.f32.mxu0 %vm439_vm0, %v438_v0  ;;  %v63_v3 = vld [vmem:[#allocation2 + $0x68] sm:$0xff]  ;;  %v62_v4 = vld [vmem:[#allocation2 + $0x60] sm:$0xff]  ;;  %v159_v5 = vld [vmem:[#allocation5 + $0x78] sm:$0xff]  ;;  %s440_s8 = smov [#allocation7]  }
  0x1e   :  { %326 = vmatprep.subr.mxu1 %v438_v0  ;;  %358 = vmatprep.mubr.msk.f32.mxu1 %vm439_vm0, %v438_v0  ;;  %v61_v6 = vld [vmem:[#allocation2 + $0x58] sm:$0xff]  ;;  %v158_v7 = vld [vmem:[#allocation5 + $0x70] sm:$0xff]  ;;  %v157_v8 = vld [vmem:[#allocation5 + $0x68] sm:$0xff]  ;;  %s245_s9 = sshll.u32 %s440_s8, 4  ;;  %s246_s9 = int_to_ptr.vmem [resolvable:$true] %s245_s9 }
  0x1f   :  { %292 = vmatpush3.msra.mxu0 %v65_v1  ;;  %327 = vmatpush3.msra.mxu1 %v159_v5  ;;  %v60_v9 = vld [vmem:[#allocation2 + $0x50] sm:$0xff]  ;;  %v156_v10 = vld [vmem:[#allocation5 + $0x60] sm:$0xff]  ;;  %v59_v11 = vld [vmem:[#allocation2 + $0x48] sm:$0xff]  ;;  %s408_s10 = scalar_lea.vmem %s246_s9, 128  ;;  %p413_p11 = scmp.lt.s32.totalorder %s246_s9, %s246_s9 }
  0x20   :  { %293 = vmatprep.subr.mxu0 %v438_v0  ;;  %328 = vmatprep.subr.mxu1 %v438_v0  ;;  %v155_v12 = vld [vmem:[#allocation5 + $0x58] sm:$0xff]  ;;  %v58_v13 = vld [vmem:[#allocation2 + $0x40] sm:$0xff]  ;;  %v154_v14 = vld [vmem:[#allocation5 + $0x50] sm:$0xff]  ;;  %p409_p10 = scmp.ne.s32.totalorder %s246_s9, %s408_s10  ;;  %p414_p12 = scmp.lt.s32.totalorder %s408_s10, %s408_s10 }
  0x21   :  { %294 = vmatpush3.msra.mxu0 %v64_v2  ;;  %329 = vmatpush3.msra.mxu1 %v158_v7  ;;  %v57_v15 = vld [vmem:[#allocation2 + $0x38] sm:$0xff]  ;;  %v153_v16 = vld [vmem:[#allocation5 + $0x48] sm:$0xff]  ;;  %v56_v17 = vld [vmem:[#allocation2 + $0x30] sm:$0xff] }
  0x22   :  { %295 = vmatprep.subr.mxu0 %v438_v0  ;;  %330 = vmatprep.subr.mxu1 %v438_v0  ;;  %v152_v18 = vld [vmem:[#allocation5 + $0x40] sm:$0xff]  ;;  %v55_v19 = vld [vmem:[#allocation2 + $0x28] sm:$0xff]  ;;  %v151_v20 = vld [vmem:[#allocation5 + $0x38] sm:$0xff]  ;;  %p415_p13 = por %p414_p12, %p413_p11 }
  0x23   :  { %296 = vmatpush3.msra.mxu0 %v63_v3  ;;  %331 = vmatpush3.msra.mxu1 %v157_v8  ;;  %v54_v21 = vld [vmem:[#allocation2 + $0x20] sm:$0xff]  ;;  %v150_v22 = vld [vmem:[#allocation5 + $0x30] sm:$0xff]  ;;  %v53_v23 = vld [vmem:[#allocation2 + $0x18] sm:$0xff] }
  0x24   :  { %297 = vmatprep.subr.mxu0 %v438_v0  ;;  %332 = vmatprep.subr.mxu1 %v438_v0  ;;  %v149_v24 = vld [vmem:[#allocation5 + $0x28] sm:$0xff]  ;;  %v52_v25 = vld [vmem:[#allocation2 + $0x10] sm:$0xff]  ;;  %v148_v26 = vld [vmem:[#allocation5 + $0x20] sm:$0xff]  ;;  %p416_p0 = pnand %p415_p13, %p409_p10 }
  0x25   :  { %298 = vmatpush3.msra.mxu0 %v62_v4  ;;  %333 = vmatpush3.msra.mxu1 %v156_v10  ;;  %v51_v27 = vld [vmem:[#allocation2 + $0x8] sm:$0xff]  ;;  %v147_v28 = vld [vmem:[#allocation5 + $0x18] sm:$0xff]  ;;  %v50_v29 = vld [vmem:[#allocation2] sm:$0xff] }
  0x26   :  { %299 = vmatprep.subr.mxu0 %v438_v0  ;;  %334 = vmatprep.subr.mxu1 %v438_v0  ;;  %v49_v30 = vld [vmem:[%s523_s0] sm:$0xff]  ;;  %v146_v31 = vld [vmem:[#allocation5 + $0x10] sm:$0xff]  ;;  %v145_v32 = vld [vmem:[#allocation5 + $0x8] sm:$0xff] }
  0x27   :  { %300 = vmatpush3.msra.mxu0 %v61_v6  ;;  %335 = vmatpush3.msra.mxu1 %v155_v12  ;;  %v144_v33 = vld [vmem:[#allocation5] sm:$0xff] }
  0x28   :  { %301 = vmatprep.subr.mxu0 %v438_v0  ;;  %336 = vmatprep.subr.mxu1 %v438_v0  ;;  %v255_v34 = vld [vmem:[%s525_s2] ss:$0 sm:$0xff] }
  0x29   :  { %302 = vmatpush3.msra.mxu0 %v60_v9  ;;  %337 = vmatpush3.msra.mxu1 %v154_v14  ;;  %v256_v39 = vld [vmem:[%s527_s4] ss:$0 sm:$0xff] }
  0x2a   :  { %303 = vmatprep.subr.mxu0 %v438_v0  ;;  %338 = vmatprep.subr.mxu1 %v438_v0 }
  0x2b   :  { %304 = vmatpush3.msra.mxu0 %v59_v11  ;;  %339 = vmatpush3.msra.mxu1 %v153_v16 }
  0x2c   :  { %305 = vmatprep.subr.mxu0 %v438_v0  ;;  %340 = vmatprep.subr.mxu1 %v438_v0 }
  0x2d   :  { %306 = vmatpush3.msra.mxu0 %v58_v13  ;;  %341 = vmatpush3.msra.mxu1 %v152_v18 }
  0x2e   :  { %307 = vmatprep.subr.mxu0 %v438_v0  ;;  %342 = vmatprep.subr.mxu1 %v438_v0 }
  0x2f   :  { %308 = vmatpush3.msra.mxu0 %v57_v15  ;;  %343 = vmatpush3.msra.mxu1 %v151_v20 }
  0x30   :  { %309 = vmatprep.subr.mxu0 %v438_v0  ;;  %344 = vmatprep.subr.mxu1 %v438_v0 }
  0x31   :  { %310 = vmatpush3.msra.mxu0 %v56_v17  ;;  %345 = vmatpush3.msra.mxu1 %v150_v22 }
  0x32   :  { %311 = vmatprep.subr.mxu0 %v438_v0  ;;  %346 = vmatprep.subr.mxu1 %v438_v0 }
  0x33   :  { %312 = vmatpush3.msra.mxu0 %v55_v19  ;;  %347 = vmatpush3.msra.mxu1 %v149_v24 }
  0x34   :  { %313 = vmatprep.subr.mxu0 %v438_v0  ;;  %348 = vmatprep.subr.mxu1 %v438_v0 }
  0x35   :  { %314 = vmatpush3.msra.mxu0 %v54_v21  ;;  %349 = vmatpush3.msra.mxu1 %v148_v26 }
  0x36   :  { %315 = vmatprep.subr.mxu0 %v438_v0  ;;  %350 = vmatprep.subr.mxu1 %v438_v0 }
  0x37   :  { %316 = vmatpush3.msra.mxu0 %v53_v23  ;;  %351 = vmatpush3.msra.mxu1 %v147_v28 }
  0x38   :  { %317 = vmatprep.subr.mxu0 %v438_v0  ;;  %352 = vmatprep.subr.mxu1 %v438_v0 }
  0x39   :  { %318 = vmatpush3.msra.mxu0 %v52_v25  ;;  %353 = vmatpush3.msra.mxu1 %v146_v31 }
  0x3a   :  { %319 = vmatprep.subr.mxu0 %v438_v0  ;;  %354 = vmatprep.subr.mxu1 %v438_v0 }
  0x3b   :  { %320 = vmatpush3.msra.mxu0 %v51_v27  ;;  %355 = vmatpush3.msra.mxu1 %v145_v32 }
  0x3c   :  { %321 = vmatprep.subr.mxu0 %v438_v0  ;;  %356 = vmatprep.subr.mxu1 %v438_v0 }
  0x3d   :  { %322 = vmatpush3.msra.mxu0 %v50_v29  ;;  %357 = vmatpush3.msra.mxu1 %v144_v33 }
  0x3e   :  { %324 = vmatmul.mubr.f32.vlgmr.msra.gmra.mxu0 %v49_v30 }
  0xfe   :  { %v139_v35 = vpop.f32.mrf.mxu0 }
  0xff   :  { %v140_v36 = vadd.f32 %v255_v34, %v139_v35 }
 0x100   :  { %v325_v37 = vpop.f32.mrf.mxu0 }
 0x101   :  { %v143_v38 = vmax.f32 %v140_v36, 0.0 }
 0x103   :  { %359 = vmatmul.mubr.f32.vlgmr.msra.gmra.mxu1 %v143_v38 }
 0x1c3   :  { %v233_v40 = vpop.f32.mrf.mxu1 }
 0x1c4   :  { %v234_v41 = vadd.f32 %v256_v39, %v233_v40 }
 0x1c5   :  { %v360_v42 = vpop.f32.mrf.mxu1 }
 0x1c6   :  { %v237_v43 = vmax.f32 %v234_v41, 0.0 }
 0x1c8   :  { %238 = vst [vmem:[#allocation7] sm:$0xff] %v237_v43 }
 0x1c9   :  { %419 = shalt.err (!%p416_p0)
}
 0x1ca   :  { %248 = dma.vmem_to_hbm [thread:$0]  %s246_s9, 128, %s528_s5, [#allocation4]  }
 0x1cb   :  { %432 = dma.done.wait [#allocation4], 128  }
 0x1cc   :  { %433 = vsyncadd [#allocation4], 4294967168 }
 0x1cd   :  { %252 = vsyncpa [#allocation3], 1 }
 0x1ce   :  { %253 = vsyncpa [#allocation6], 1 }
 0x1cf   :  { %254 = vsyncpa [#allocation4], 1 }

</bundles_post_ra>
